<compile_context>
chip_gen: v5e
topology: v5e:2x2
jax: 0.10.0
libtpu: 0.0.40
codegen_flags: <defaults>
</compile_context>

<pallas_src>
import jax
import jax.numpy as jnp
from jax.experimental import pallas as pl
from jax.experimental.pallas import tpu as pltpu


def _normalize_kernel(stats_ref, x_ref, o_ref):
    # stats_ref: (rows, 2) compute-dtype, columns = [scale, bias]; broadcast
    #            along the lane dim.
    # x_ref, o_ref: (rows, L) tiles in VMEM.
    scale = stats_ref[:, 0:1]
    bias = stats_ref[:, 1:2]
    xv = x_ref[...].astype(stats_ref.dtype)
    o_ref[...] = (xv * scale + bias).astype(o_ref.dtype)


def _device_kind() -> str:
    try:
        return jax.devices()[0].device_kind.lower()
    except Exception:
        return ""


def _choose_row_block(n_rows: int, n_lanes: int, itemsize: int, *,
                      sublane_align: int, target_bytes: int,
                      min_grid_steps: int) -> int:
    """Pick a sublane-aligned row-block size near `target_bytes` per x-block."""
    bytes_per_row = max(1, n_lanes * itemsize)
    rows = max(1, target_bytes // bytes_per_row)
    # Keep the grid at least `min_grid_steps` deep when the problem allows it
    # (keeps both v7x TensorCores busy and the double-buffer pipeline full).
    rows = min(rows, max(1, -(-n_rows // min_grid_steps)))
    if rows >= n_rows:
        return n_rows                                  # full extent: always legal
    rows = max(sublane_align, (rows // sublane_align) * sublane_align)
    rows = min(rows, n_rows)
    if rows == n_rows:
        return n_rows
    # Prefer an even step count: the single 'parallel' grid axis is sharded
    # across v7x's 2 TensorCores, and an odd count idles one core for a step.
    steps = -(-n_rows // rows)
    if steps > 1 and steps % 2 == 1:
        r = rows - sublane_align
        floor = max(sublane_align, rows // 2)
        while r >= floor:
            if (-(-n_rows // r)) % 2 == 0:
                rows = r
                break
            r -= sublane_align
    return rows


def normalize_layer(x: jax.Array, means: jax.Array, sds: jax.Array, *,
                    donate_input: bool = False) -> jax.Array:
    """(x - means[c]) / sds[c], broadcast over batch and spatial dims. x is NCHW."""
    B, C, H, W = x.shape
    N = B * C                      # rows of the flattened view
    L = H * W                      # lanes of the flattened view
    itemsize = jnp.dtype(x.dtype).itemsize

    kind = _device_kind()
    is_v5 = "v5" in kind
    is_v7 = "v7" in kind

    # bf16 math is fine on v6e/v7x (bf16 VPU); keep f32 on v5e and for all
    # other input dtypes.  Normalization easily tolerates bf16 arithmetic.
    if x.dtype == jnp.bfloat16 and not is_v5:
        compute_dtype = jnp.bfloat16
    else:
        compute_dtype = jnp.float32

    # Fused per-row stats: scale = 1/sd, bias = -mean/sd (divide replaced by a
    # precomputed reciprocal multiply).  Row r of x.reshape(N, L) corresponds
    # to channel r % C, matching jnp.tile's repeat order.
    scale_c = 1.0 / sds.astype(jnp.float32)
    bias_c = -means.astype(jnp.float32) * scale_c
    row_stats = jnp.stack(
        [jnp.tile(scale_c, B), jnp.tile(bias_c, B)], axis=-1
    ).astype(compute_dtype)                            # (N, 2)

    # Lane-density guard: keep the output slab a multiple of 128 lanes wide so
    # stores stay unmasked (7x7 / 14x14 feature maps would otherwise hit
    # vst.msk on every row).  CIFAR (1024) and 224x224 (50176) need no pad.
    x2 = x.reshape(N, L)
    L_pad = -(-L // 128) * 128
    if L_pad != L:
        x2 = jnp.pad(x2, ((0, 0), (0, L_pad - L)))

    # Generation-aware block sizing.
    sublane_align = max(8, 32 // itemsize)             # f32:8, bf16:16, int8/fp8:32
    if is_v7:
        target_bytes = 4 * 1024 * 1024                 # re-amortize step cost at 3.2 TB/s
        min_grid_steps = 8                             # >= 4 steps per TensorCore
    else:
        target_bytes = 2 * 1024 * 1024                 # v5e/v6e sweet spot, VMEM-safe
        min_grid_steps = 1
    rows_per_block = _choose_row_block(
        N, L_pad, itemsize,
        sublane_align=sublane_align,
        target_bytes=target_bytes,
        min_grid_steps=min_grid_steps,
    )
    grid = (pl.cdiv(N, rows_per_block),)

    total_elems = N * L_pad
    cost = pl.CostEstimate(
        flops=2 * total_elems,                         # one mul + one add per element
        transcendentals=0,
        bytes_accessed=2 * total_elems * itemsize
        + int(row_stats.size) * jnp.dtype(compute_dtype).itemsize,
    )

    kwargs = {}
    if donate_input:
        # Reuse x's HBM buffer for the output (traffic unchanged, allocation saved).
        kwargs["input_output_aliases"] = {1: 0}

    out2 = pl.pallas_call(
        _normalize_kernel,
        out_shape=jax.ShapeDtypeStruct((N, L_pad), x.dtype),
        grid_spec=pl.GridSpec(
            grid=grid,
            in_specs=[
                pl.BlockSpec((rows_per_block, 2), lambda i: (i, 0)),       # fused stats
                pl.BlockSpec((rows_per_block, L_pad), lambda i: (i, 0)),   # x
            ],
            out_specs=pl.BlockSpec((rows_per_block, L_pad), lambda i: (i, 0)),
        ),
        compiler_params=pltpu.CompilerParams(
            dimension_semantics=("parallel",),
        ),
        cost_estimate=cost,
        **kwargs,
    )(row_stats, x2)

    if L_pad != L:
        out2 = out2[:, :L]
    return out2.reshape(B, C, H, W)


if __name__ == "__main__":
    B, C, H, W = 2, 4, 16, 16
    key = jax.random.PRNGKey(0)
    kx, _, _ = jax.random.split(key, 3)

    x = jax.random.normal(kx, (B, C, H, W), dtype=jnp.float32)
    # Deterministic per-channel "dataset" statistics (synthetic, in-script).
    means = jnp.array([0.4914, 0.4822, 0.4465, 0.5000][:C], dtype=jnp.float32)
    sds = jnp.array([0.2023, 0.1994, 0.2010, 0.2500][:C], dtype=jnp.float32)

    out = normalize_layer(x, means, sds)
    out = jax.block_until_ready(out)

    # Reference (plain JAX broadcasting, same math as the PyTorch forward).
    ref = (x - means[None, :, None, None]) / sds[None, :, None, None]
    assert out.shape == (B, C, H, W)
    assert jnp.allclose(out, ref, atol=1e-5, rtol=1e-5)

    print("KERNEL_OK")
</pallas_src>

<mosaic_0001>
module attributes {stable_mosaic.version = 11 : i64} {
  func.func @_normalize_kernel(%arg0: i32, %arg1: memref<8x2xf32, #tpu.memory_space<vmem>>, %arg2: memref<8x256xf32, #tpu.memory_space<vmem>>, %arg3: memref<8x256xf32, #tpu.memory_space<vmem>>) attributes {dimension_semantics = [#tpu.dimension_semantics<parallel>], iteration_bounds = array<i64: 1>, scalar_prefetch = 0 : i64, scratch_operands = 0 : i64, tpu.core_type = #tpu.core_type<tc>, window_params = [{transform_indices = @transform_0, window_bounds = array<i64: 8, 2>}, {transform_indices = @transform_1, window_bounds = array<i64: 8, 256>}, {transform_indices = @transform_2, window_bounds = array<i64: 8, 256>}]} {
    %c0 = arith.constant 0 : index
    %c0_0 = arith.constant 0 : index
    %0 = vector.load %arg1[%c0, %c0_0] : memref<8x2xf32, #tpu.memory_space<vmem>>, vector<8x1xf32>
    %c0_1 = arith.constant 0 : index
    %c1 = arith.constant 1 : index
    %1 = vector.load %arg1[%c0_1, %c1] : memref<8x2xf32, #tpu.memory_space<vmem>>, vector<8x1xf32>
    %c0_2 = arith.constant 0 : index
    %c0_3 = arith.constant 0 : index
    %2 = vector.load %arg2[%c0_2, %c0_3] : memref<8x256xf32, #tpu.memory_space<vmem>>, vector<8x256xf32>
    %3 = vector.broadcast %0 : vector<8x1xf32> to vector<8x256xf32>
    %4 = arith.mulf %2, %3 : vector<8x256xf32>
    %5 = vector.broadcast %1 : vector<8x1xf32> to vector<8x256xf32>
    %6 = arith.addf %4, %5 : vector<8x256xf32>
    %c0_4 = arith.constant 0 : index
    %c0_5 = arith.constant 0 : index
    %7 = vector.load %arg3[%c0_4, %c0_5] : memref<8x256xf32, #tpu.memory_space<vmem>>, vector<8x256xf32>
    tpu.vector_store %arg3[%c0_4, %c0_5], %6 {strides = array<i32>} : memref<8x256xf32, #tpu.memory_space<vmem>>, vector<8x256xf32>,
    return
  }
  func.func @transform_0(%arg0: i32) -> (i32, i32) {
    %c0_i32 = arith.constant 0 : i32
    %c0_i32_0 = arith.constant 0 : i32
    return %arg0, %c0_i32 : i32, i32
  }
  func.func @transform_1(%arg0: i32) -> (i32, i32) {
    %c0_i32 = arith.constant 0 : i32
    %c0_i32_0 = arith.constant 0 : i32
    return %arg0, %c0_i32 : i32, i32
  }
  func.func @transform_2(%arg0: i32) -> (i32, i32) {
    %c0_i32 = arith.constant 0 : i32
    %c0_i32_0 = arith.constant 0 : i32
    return %arg0, %c0_i32 : i32, i32
  }
}

</mosaic_0001>

<bundles_post_ra>
// kernel: tpu_custom_call.1
= control target key start
LH: loop header
LB: loop body
LE: loop exit
PB: predicated region body
PF: predicated region fallthrough
CT: control target
= control target key end

     0   :  { %7 = vsyncpa [#allocation3], 0  ;;  %s147_s0 = inlined_call_operand.vmem [shape: f32[8,2], index: 0, kind: input, shape index: {}]   ;;  %s148_s1 = inlined_call_operand.hbm [shape: f32[8,256], index: 1, kind: input, shape index: {}]   ;;  %s149_s2 = inlined_call_operand.hbm [shape: f32[8,256], index: 2, kind: output, shape index: {}]  }
   0x1   :  { %8 = vsyncpa [#allocation4], 0  ;;  %s16_s11 = sshll.u32 %s148_s1, 4  ;;  %s119_s12 = smov [#allocation2]   ;;  %s17_s11 = int_to_ptr.hbm [resolvable:$true] %s16_s11 }
   0x2   :  { %s18_s13 = sshll.u32 %s119_s12, 4  ;;  %s19_s13 = int_to_ptr.vmem [resolvable:$true] %s18_s13 }
   0x3   :  { %21 = dma.hbm_to_vmem [thread:$0]  %s17_s11, 256, %s19_s13, [#allocation3]  }
   0x4   :  { %115 = dma.done.wait [#allocation3], 256  }
   0x5   :  { %116 = vsyncadd [#allocation3], 4294967040  ;;  %v120_v0 = vmov 0   ;;  %v26_v1 = vld [vmem:[%s147_s0] sm:$0xff]  ;;  %v121_v2 = vmov 1   ;;  %v28_v5 = vld [vmem:[#allocation2 + $0x8] sm:$0xff] }
   0x6   :  { %65 = vset.pattern.permute.xlu0 %v120_v0  ;;  %v27_v4 = vld [vmem:[#allocation2] sm:$0xff]  ;;  %s122_s1 = smov [#allocation5]   ;;  %s51_s19 = sshll.u32 %s149_s2, 4  ;;  %s52_s19 = int_to_ptr.hbm [resolvable:$true] %s51_s19 }
   0x7   :  { %31 = vperm.xlu0 %65, %v26_v1   ;;  %s49_s16 = sshll.u32 %s122_s1, 4  ;;  %s50_s16 = int_to_ptr.vmem [resolvable:$true] %s49_s16 }
   0xf   :  { %66 = vset.pattern.permute.xlu0 %v121_v2 }
  0x10   :  { %37 = vperm.xlu0 %66, %v26_v1  }
  0x79   :  { %v32_v3 = vpop.permute.xlu0 %31 }
  0x7a   :  { %v34_v6 = vmul.f32 %v32_v3, %v27_v4  ;;  %v35_v7 = vmul.f32 %v32_v3, %v28_v5 }
  0x82   :  { %v38_v8 = vpop.permute.xlu0 %37 }
  0x83   :  { %v40_v9 = vadd.f32 %v38_v8, %v34_v6  ;;  %v41_v10 = vadd.f32 %v38_v8, %v35_v7 }
  0x85   :  { %42 = vst [vmem:[#allocation5] sm:$0xff] %v40_v9 }
  0x86   :  { %43 = vst [vmem:[#allocation5 + $0x8] sm:$0xff] %v41_v10 }
  0x87   :  { %54 = dma.vmem_to_hbm [thread:$0]  %s50_s16, 256, %s52_s19, [#allocation4]  }
  0x88   :  { %117 = dma.done.wait [#allocation4], 256  }
  0x89   :  { %118 = vsyncadd [#allocation4], 4294967040 }
  0x8a   :  { %59 = vsyncpa [#allocation3], 1 }
  0x8b   :  { %60 = vsyncpa [#allocation4], 1 }

</bundles_post_ra>
